<compile_context>
chip_gen: v7x
topology: tpu7x:2x2x1
jax: 0.10.0
libtpu: 0.0.40
codegen_flags: <defaults>
</compile_context>

<pallas_src>
import math
import functools

import jax
import jax.numpy as jnp
from jax.experimental import pallas as pl
from jax.experimental.pallas import tpu as pltpu


# ----------------------------- configuration --------------------------------
IN_DIM = 32
NUM_HEADS = 4
HEAD_DIM = IN_DIM // NUM_HEADS
USE_COSINE = True
USE_WN = True
USE_FORCED_WN = False   # only affects training-mode in-place weight update


# ------------------------- parameter preparation (glue) ---------------------
def qkv_normalize(w: jnp.ndarray, in_dim: int, eps: float = 1e-4) -> jnp.ndarray:
    """Row-wise normalization of the (3*D, D) qkv weight, as in the module."""
    w3 = w.reshape(3, in_dim, in_dim)
    norm = jnp.sqrt(jnp.sum(w3 * w3, axis=-1, keepdims=True))
    w3 = w3 * math.sqrt(in_dim) / (norm + eps)
    return w3.reshape(3 * in_dim, in_dim)


def mplinear_effective_weight(w: jnp.ndarray, use_wn: bool,
                              eps: float = 1e-4) -> jnp.ndarray:
    """Assumed MPLinear: rows normalized to unit norm when use_wn=True."""
    if not use_wn:
        return w
    norm = jnp.sqrt(jnp.sum(w * w, axis=-1, keepdims=True))
    return w / (norm + eps)


# ------------------------------- Pallas kernel -------------------------------
def _attention_kernel(x_ref, qkvwT_ref, outwT_ref, o_ref, *,
                      B, T, num_heads, head_dim, scale, use_cosine):
    """Single fused invocation: full MHA forward for all batches/heads.

    x_ref      : (B*T, D)   VMEM  (flattened activations)
    qkvwT_ref  : (D, 3D)    VMEM  (effective qkv weight, pre-transposed)
    outwT_ref  : (D, D)     VMEM  (effective out-proj weight, pre-transposed)
    o_ref      : (B*T, D)   VMEM
    """
    D = num_heads * head_dim

    x = x_ref[...]                 # (B*T, D)  already in compute dtype
    w_qkv = qkvwT_ref[...]         # (D, 3D)
    w_out = outwT_ref[...]         # (D, D)

    # (1) single QKV projection on the MXU (weight pre-transposed -> no .T)
    qkv = jnp.dot(x, w_qkv, preferred_element_type=jnp.float32)   # (B*T, 3D)
    qkv = qkv.reshape(B, T, 3 * D)                                # leading split

    # (2) head-batched q/k/v : (H*B, T, hd)
    def split_heads(base):
        slabs = [qkv[:, :, base + h * head_dim: base + (h + 1) * head_dim]
                 for h in range(num_heads)]                       # each (B, T, hd)
        return jnp.stack(slabs, axis=0).reshape(num_heads * B, T, head_dim)

    q = split_heads(0)
    k = split_heads(D)
    v = split_heads(2 * D)

    if use_cosine:
        qn = jnp.sqrt(jnp.sum(q * q, axis=-1, keepdims=True))
        kn = jnp.sqrt(jnp.sum(k * k, axis=-1, keepdims=True))
        q = q / jnp.maximum(qn, 1e-12)
        k = k / jnp.maximum(kn, 1e-12)

    # fold softmax scale into q: scales a (T, hd) tile instead of a (T, T) tile
    q = q * scale

    # (3) scores + softmax, ONE batched dot_general over (head x batch)
    s = jnp.einsum('ntd,nsd->nts', q, k,
                   preferred_element_type=jnp.float32)            # (N, T, T)
    m = jnp.max(s, axis=-1, keepdims=True)
    p = jnp.exp(s - m)
    denom = jnp.sum(p, axis=-1, keepdims=True)                    # (N, T, 1)
    o = jnp.einsum('nts,nsd->ntd', p, v,
                   preferred_element_type=jnp.float32)            # (N, T, hd)
    # normalize the (T, hd) output (EUP approx reciprocal), not the (T, T) probs
    o = o * pl.reciprocal(denom, approx=True)

    # (4) rejoin heads and single fused out-projection
    o4 = o.reshape(num_heads, B, T, head_dim)
    attn = jnp.concatenate([o4[h] for h in range(num_heads)], axis=-1)  # (B,T,D)
    attn = attn.reshape(B * T, D)
    y = jnp.dot(attn, w_out, preferred_element_type=jnp.float32)        # (B*T,D)
    o_ref[...] = y.astype(o_ref.dtype)


# ------------------------------- wrapper -------------------------------------
def attention_forward(x, qkv_weight, out_weight, *,
                      num_heads=NUM_HEADS,
                      use_cosine=USE_COSINE,
                      use_wn=USE_WN):
    """x: (B, T, D) -> (B, T, D)"""
    B, T, D = x.shape
    head_dim = D // num_heads
    scale = 1.0 / math.sqrt(head_dim)

    # effective (weight-normalized) parameters -- glue, not hot path
    if use_wn:
        qkv_w_eff = qkv_normalize(qkv_weight, D) / math.sqrt(D)
    else:
        qkv_w_eff = qkv_weight
    out_w_eff = mplinear_effective_weight(out_weight, use_wn)

    # pre-cast + pre-transpose (free XLA glue; kernel sees MXU-ready operands)
    compute_dtype = jnp.float32   # bf16 is worthwhile on v6e/v7x at larger sizes
    qkv_wT = qkv_w_eff.astype(compute_dtype).T        # (D, 3D)
    out_wT = out_w_eff.astype(compute_dtype).T        # (D, D)
    x2d = x.reshape(B * T, D).astype(compute_dtype)   # (B*T, D)

    kernel = functools.partial(
        _attention_kernel,
        B=B, T=T, num_heads=num_heads, head_dim=head_dim,
        scale=scale, use_cosine=use_cosine)

    # Collapsed grid: one invocation, whole (tiny) operands resident in VMEM.
    y2d = pl.pallas_call(
        kernel,
        out_shape=jax.ShapeDtypeStruct((B * T, D), x.dtype),
        in_specs=[
            pl.BlockSpec(memory_space=pltpu.MemorySpace.VMEM),
            pl.BlockSpec(memory_space=pltpu.MemorySpace.VMEM),
            pl.BlockSpec(memory_space=pltpu.MemorySpace.VMEM),
        ],
        out_specs=pl.BlockSpec(memory_space=pltpu.MemorySpace.VMEM),
    )(x2d, qkv_wT, out_wT)

    return y2d.reshape(B, T, D)


# ----------------------------- pure-JAX reference ----------------------------
def attention_reference(x, qkv_weight, out_weight, *,
                        num_heads=NUM_HEADS,
                        use_cosine=USE_COSINE,
                        use_wn=USE_WN):
    B, T, D = x.shape
    hd = D // num_heads
    scale = 1.0 / math.sqrt(hd)
    if use_wn:
        qkv_w = qkv_normalize(qkv_weight, D) / math.sqrt(D)
    else:
        qkv_w = qkv_weight
    out_w = mplinear_effective_weight(out_weight, use_wn)

    qkv = jnp.einsum("btd,ed->bte", x, qkv_w)
    q, k, v = jnp.split(qkv, 3, axis=-1)

    def to_heads(t):
        return t.reshape(B, T, num_heads, hd).transpose(0, 2, 1, 3)

    q, k, v = to_heads(q), to_heads(k), to_heads(v)
    if use_cosine:
        q = q / jnp.maximum(jnp.linalg.norm(q, axis=-1, keepdims=True), 1e-12)
        k = k / jnp.maximum(jnp.linalg.norm(k, axis=-1, keepdims=True), 1e-12)
    s = jnp.einsum("bhqd,bhkd->bhqk", q, k) * scale
    p = jax.nn.softmax(s, axis=-1)
    o = jnp.einsum("bhqk,bhkd->bhqd", p, v)
    o = o.transpose(0, 2, 1, 3).reshape(B, T, D)
    return jnp.einsum("btd,ed->bte", o, out_w)


# ---------------------------------- main --------------------------------------
if __name__ == "__main__":
    B, T, D = 2, 8, IN_DIM
    key = jax.random.PRNGKey(0)
    kx, kqkv, kout = jax.random.split(key, 3)

    x = jax.random.normal(kx, (B, T, D), dtype=jnp.float32)
    # use_wn=True -> nn.init.normal_ on qkv weight; MPLinear weight ~ normal too
    qkv_weight = jax.random.normal(kqkv, (3 * D, D), dtype=jnp.float32)
    out_weight = jax.random.normal(kout, (D, D), dtype=jnp.float32)

    y = attention_forward(x, qkv_weight, out_weight)
    y = jax.block_until_ready(y)

    y_ref = attention_reference(x, qkv_weight, out_weight)
    assert y.shape == (B, T, D)
    # tolerance slightly loosened because the softmax denominator uses the
    # approximate EUP reciprocal (pl.reciprocal(..., approx=True)).
    max_err = float(jnp.max(jnp.abs(y - y_ref)))
    assert jnp.allclose(y, y_ref, atol=5e-3, rtol=5e-3), (
        f"mismatch vs reference (max abs err {max_err})")

    print("KERNEL_OK")
</pallas_src>

<mosaic_0001>
module attributes {stable_mosaic.version = 11 : i64} {
  func.func @_attention_kernel(%arg0: memref<16x32xf32, #tpu.memory_space<vmem>>, %arg1: memref<32x96xf32, #tpu.memory_space<vmem>>, %arg2: memref<32x32xf32, #tpu.memory_space<vmem>>, %arg3: memref<16x32xf32, #tpu.memory_space<vmem>>) attributes {dimension_semantics = [], scalar_prefetch = 0 : i64, scratch_operands = 0 : i64, tpu.core_type = #tpu.core_type<tc>} {
    %c0 = arith.constant 0 : index
    %c0_0 = arith.constant 0 : index
    %0 = vector.load %arg0[%c0, %c0_0] : memref<16x32xf32, #tpu.memory_space<vmem>>, vector<16x32xf32>
    %c0_1 = arith.constant 0 : index
    %c0_2 = arith.constant 0 : index
    %1 = vector.load %arg1[%c0_1, %c0_2] : memref<32x96xf32, #tpu.memory_space<vmem>>, vector<32x96xf32>
    %c0_3 = arith.constant 0 : index
    %c0_4 = arith.constant 0 : index
    %2 = vector.load %arg2[%c0_3, %c0_4] : memref<32x32xf32, #tpu.memory_space<vmem>>, vector<32x32xf32>
    %cst = arith.constant dense<0.000000e+00> : vector<16x96xf32>
    %3 = tpu.matmul %0, %1, %cst {dimension_numbers = #tpu.dot_dimension_numbers<[1], [0], [0], [1], [0, 0, 1, 1], [], []>} : vector<16x32xf32>, vector<32x96xf32>, vector<16x96xf32> -> vector<16x96xf32>
    %4 = vector.shape_cast %3 : vector<16x96xf32> to vector<2x8x96xf32>
    %5 = vector.extract_strided_slice %4 {offsets = [0, 0, 0], sizes = [2, 8, 8], strides = [1, 1, 1]} : vector<2x8x96xf32> to vector<2x8x8xf32>
    %6 = vector.extract_strided_slice %4 {offsets = [0, 0, 8], sizes = [2, 8, 8], strides = [1, 1, 1]} : vector<2x8x96xf32> to vector<2x8x8xf32>
    %7 = vector.extract_strided_slice %4 {offsets = [0, 0, 16], sizes = [2, 8, 8], strides = [1, 1, 1]} : vector<2x8x96xf32> to vector<2x8x8xf32>
    %8 = vector.extract_strided_slice %4 {offsets = [0, 0, 24], sizes = [2, 8, 8], strides = [1, 1, 1]} : vector<2x8x96xf32> to vector<2x8x8xf32>
    %9 = vector.shape_cast %5 : vector<2x8x8xf32> to vector<1x2x8x8xf32>
    %10 = vector.shape_cast %6 : vector<2x8x8xf32> to vector<1x2x8x8xf32>
    %11 = vector.shape_cast %7 : vector<2x8x8xf32> to vector<1x2x8x8xf32>
    %12 = vector.shape_cast %8 : vector<2x8x8xf32> to vector<1x2x8x8xf32>
    %13 = tpu.concatenate %9, %10, %11, %12 in 0 : vector<1x2x8x8xf32>, vector<1x2x8x8xf32>, vector<1x2x8x8xf32>, vector<1x2x8x8xf32> -> vector<4x2x8x8xf32>
    %14 = vector.shape_cast %13 : vector<4x2x8x8xf32> to vector<8x8x8xf32>
    %15 = vector.extract_strided_slice %4 {offsets = [0, 0, 32], sizes = [2, 8, 8], strides = [1, 1, 1]} : vector<2x8x96xf32> to vector<2x8x8xf32>
    %16 = vector.extract_strided_slice %4 {offsets = [0, 0, 40], sizes = [2, 8, 8], strides = [1, 1, 1]} : vector<2x8x96xf32> to vector<2x8x8xf32>
    %17 = vector.extract_strided_slice %4 {offsets = [0, 0, 48], sizes = [2, 8, 8], strides = [1, 1, 1]} : vector<2x8x96xf32> to vector<2x8x8xf32>
    %18 = vector.extract_strided_slice %4 {offsets = [0, 0, 56], sizes = [2, 8, 8], strides = [1, 1, 1]} : vector<2x8x96xf32> to vector<2x8x8xf32>
    %19 = vector.shape_cast %15 : vector<2x8x8xf32> to vector<1x2x8x8xf32>
    %20 = vector.shape_cast %16 : vector<2x8x8xf32> to vector<1x2x8x8xf32>
    %21 = vector.shape_cast %17 : vector<2x8x8xf32> to vector<1x2x8x8xf32>
    %22 = vector.shape_cast %18 : vector<2x8x8xf32> to vector<1x2x8x8xf32>
    %23 = tpu.concatenate %19, %20, %21, %22 in 0 : vector<1x2x8x8xf32>, vector<1x2x8x8xf32>, vector<1x2x8x8xf32>, vector<1x2x8x8xf32> -> vector<4x2x8x8xf32>
    %24 = vector.shape_cast %23 : vector<4x2x8x8xf32> to vector<8x8x8xf32>
    %25 = vector.extract_strided_slice %4 {offsets = [0, 0, 64], sizes = [2, 8, 8], strides = [1, 1, 1]} : vector<2x8x96xf32> to vector<2x8x8xf32>
    %26 = vector.extract_strided_slice %4 {offsets = [0, 0, 72], sizes = [2, 8, 8], strides = [1, 1, 1]} : vector<2x8x96xf32> to vector<2x8x8xf32>
    %27 = vector.extract_strided_slice %4 {offsets = [0, 0, 80], sizes = [2, 8, 8], strides = [1, 1, 1]} : vector<2x8x96xf32> to vector<2x8x8xf32>
    %28 = vector.extract_strided_slice %4 {offsets = [0, 0, 88], sizes = [2, 8, 8], strides = [1, 1, 1]} : vector<2x8x96xf32> to vector<2x8x8xf32>
    %29 = vector.shape_cast %25 : vector<2x8x8xf32> to vector<1x2x8x8xf32>
    %30 = vector.shape_cast %26 : vector<2x8x8xf32> to vector<1x2x8x8xf32>
    %31 = vector.shape_cast %27 : vector<2x8x8xf32> to vector<1x2x8x8xf32>
    %32 = vector.shape_cast %28 : vector<2x8x8xf32> to vector<1x2x8x8xf32>
    %33 = tpu.concatenate %29, %30, %31, %32 in 0 : vector<1x2x8x8xf32>, vector<1x2x8x8xf32>, vector<1x2x8x8xf32>, vector<1x2x8x8xf32> -> vector<4x2x8x8xf32>
    %34 = vector.shape_cast %33 : vector<4x2x8x8xf32> to vector<8x8x8xf32>
    %35 = arith.mulf %14, %14 : vector<8x8x8xf32>
    %cst_5 = arith.constant dense<0.000000e+00> : vector<8x8xf32>
    %36 = vector.multi_reduction <add>, %35, %cst_5 [2] : vector<8x8x8xf32> to vector<8x8xf32>
    %37 = vector.shape_cast %36 : vector<8x8xf32> to vector<8x8x1xf32>
    %38 = math.sqrt %37 : vector<8x8x1xf32>
    %39 = arith.mulf %24, %24 : vector<8x8x8xf32>
    %cst_6 = arith.constant dense<0.000000e+00> : vector<8x8xf32>
    %40 = vector.multi_reduction <add>, %39, %cst_6 [2] : vector<8x8x8xf32> to vector<8x8xf32>
    %41 = vector.shape_cast %40 : vector<8x8xf32> to vector<8x8x1xf32>
    %42 = math.sqrt %41 : vector<8x8x1xf32>
    %cst_7 = arith.constant 9.99999996E-13 : f32
    %43 = vector.broadcast %cst_7 : f32 to vector<8x8x1xf32>
    %44 = arith.maximumf %38, %43 : vector<8x8x1xf32>
    %45 = vector.broadcast %44 : vector<8x8x1xf32> to vector<8x8x8xf32>
    %46 = arith.divf %14, %45 : vector<8x8x8xf32>
    %cst_8 = arith.constant 9.99999996E-13 : f32
    %47 = vector.broadcast %cst_8 : f32 to vector<8x8x1xf32>
    %48 = arith.maximumf %42, %47 : vector<8x8x1xf32>
    %49 = vector.broadcast %48 : vector<8x8x1xf32> to vector<8x8x8xf32>
    %50 = arith.divf %24, %49 : vector<8x8x8xf32>
    %cst_9 = arith.constant 0.353553385 : f32
    %51 = vector.broadcast %cst_9 : f32 to vector<8x8x8xf32>
    %52 = arith.mulf %46, %51 : vector<8x8x8xf32>
    "tpu.trace_start"() <{level = 10 : i32, message = "ntd,nsd->nts"}> : () -> ()
    %cst_10 = arith.constant dense<0.000000e+00> : vector<8x8x8xf32>
    %53 = tpu.matmul %52, %50, %cst_10 {dimension_numbers = #tpu.dot_dimension_numbers<[2], [2], [1], [1], [0, 0, 0, 1, 1, 1], [0], [0]>} : vector<8x8x8xf32>, vector<8x8x8xf32>, vector<8x8x8xf32> -> vector<8x8x8xf32>
    "tpu.trace_stop"() : () -> ()
    %cst_11 = arith.constant dense<0xFF800000> : vector<8x8xf32>
    %54 = vector.multi_reduction <maximumf>, %53, %cst_11 [2] : vector<8x8x8xf32> to vector<8x8xf32>
    %55 = vector.shape_cast %54 : vector<8x8xf32> to vector<8x8x1xf32>
    %56 = vector.broadcast %55 : vector<8x8x1xf32> to vector<8x8x8xf32>
    %57 = arith.subf %53, %56 : vector<8x8x8xf32>
    %58 = math.exp %57 : vector<8x8x8xf32>
    %cst_12 = arith.constant dense<0.000000e+00> : vector<8x8xf32>
    %59 = vector.multi_reduction <add>, %58, %cst_12 [2] : vector<8x8x8xf32> to vector<8x8xf32>
    %60 = vector.shape_cast %59 : vector<8x8xf32> to vector<8x8x1xf32>
    "tpu.trace_start"() <{level = 10 : i32, message = "nts,nsd->ntd"}> : () -> ()
    %cst_13 = arith.constant dense<0.000000e+00> : vector<8x8x8xf32>
    %61 = tpu.matmul %58, %34, %cst_13 {dimension_numbers = #tpu.dot_dimension_numbers<[2], [1], [1], [2], [0, 0, 0, 1, 1, 2], [0], [0]>} : vector<8x8x8xf32>, vector<8x8x8xf32>, vector<8x8x8xf32> -> vector<8x8x8xf32>
    "tpu.trace_stop"() : () -> ()
    %62 = tpu.reciprocal %60 {approx = true} : vector<8x8x1xf32> -> vector<8x8x1xf32>
    %63 = vector.broadcast %62 : vector<8x8x1xf32> to vector<8x8x8xf32>
    %64 = arith.mulf %61, %63 : vector<8x8x8xf32>
    %65 = vector.shape_cast %64 : vector<8x8x8xf32> to vector<4x2x8x8xf32>
    %66 = vector.extract_strided_slice %65 {offsets = [0, 0, 0, 0], sizes = [1, 2, 8, 8], strides = [1, 1, 1, 1]} : vector<4x2x8x8xf32> to vector<1x2x8x8xf32>
    %67 = vector.shape_cast %66 : vector<1x2x8x8xf32> to vector<2x8x8xf32>
    %68 = vector.extract_strided_slice %65 {offsets = [1, 0, 0, 0], sizes = [1, 2, 8, 8], strides = [1, 1, 1, 1]} : vector<4x2x8x8xf32> to vector<1x2x8x8xf32>
    %69 = vector.shape_cast %68 : vector<1x2x8x8xf32> to vector<2x8x8xf32>
    %70 = vector.extract_strided_slice %65 {offsets = [2, 0, 0, 0], sizes = [1, 2, 8, 8], strides = [1, 1, 1, 1]} : vector<4x2x8x8xf32> to vector<1x2x8x8xf32>
    %71 = vector.shape_cast %70 : vector<1x2x8x8xf32> to vector<2x8x8xf32>
    %72 = vector.extract_strided_slice %65 {offsets = [3, 0, 0, 0], sizes = [1, 2, 8, 8], strides = [1, 1, 1, 1]} : vector<4x2x8x8xf32> to vector<1x2x8x8xf32>
    %73 = vector.shape_cast %72 : vector<1x2x8x8xf32> to vector<2x8x8xf32>
    %74 = tpu.concatenate %67, %69, %71, %73 in 2 : vector<2x8x8xf32>, vector<2x8x8xf32>, vector<2x8x8xf32>, vector<2x8x8xf32> -> vector<2x8x32xf32>
    %75 = vector.shape_cast %74 : vector<2x8x32xf32> to vector<16x32xf32>
    %cst_14 = arith.constant dense<0.000000e+00> : vector<16x32xf32>
    %76 = tpu.matmul %75, %2, %cst_14 {dimension_numbers = #tpu.dot_dimension_numbers<[1], [0], [0], [1], [0, 0, 1, 1], [], []>} : vector<16x32xf32>, vector<32x32xf32>, vector<16x32xf32> -> vector<16x32xf32>
    %c0_15 = arith.constant 0 : index
    %c0_16 = arith.constant 0 : index
    %77 = vector.load %arg3[%c0_15, %c0_16] : memref<16x32xf32, #tpu.memory_space<vmem>>, vector<16x32xf32>
    tpu.vector_store %arg3[%c0_15, %c0_16], %76 {strides = array<i32>} : memref<16x32xf32, #tpu.memory_space<vmem>>, vector<16x32xf32>,
    return
  }
}

</mosaic_0001>

<bundles_post_ra>
// kernel: tpu_custom_call.1
= control target key start
LH: loop header
LB: loop body
LE: loop exit
PB: predicated region body
PF: predicated region fallthrough
CT: control target
= control target key end

     0   :  { %8 = vsyncpa [#allocation3], 0  ;;  %s2613_s0 = inlined_call_operand.hbm [shape: f32[16,32], index: 0, kind: input, shape index: {}]   ;;  %s2614_s1 = inlined_call_operand.hbm [shape: f32[32,96], index: 1, kind: input, shape index: {}]   ;;  %s2615_s2 = inlined_call_operand.hbm [shape: f32[32,32], index: 2, kind: input, shape index: {}]   ;;  %s2616_s3 = inlined_call_operand.hbm [shape: f32[16,32], index: 3, kind: output, shape index: {}]  }
   0x1   :  { %9 = vsyncpa [#allocation6], 0 }
   0x2   :  { %10 = vsyncpa [#allocation4], 0  ;;  %s2273_s12 = smov [#allocation5]   ;;  %s2274_s14 = smov [#allocation2]  }
   0x3   :  { %s28_s13 = sshll.u32 %s2273_s12, 4  ;;  %s16_s15 = sshll.u32 %s2274_s14, 4  ;;  %s29_s13 = int_to_ptr.vmem [resolvable:$true] %s28_s13  ;;  %s2308_s15 = int_to_ptr.vmem [resolvable:$true] %s16_s15 }
   0x4   :  { %s2179_s18 = scalar_lea.hbm %s2614_s1, 512 }
   0x5   :  { %p2180_p0 = scmp.ne.s32.totalorder %s2614_s1, %s2179_s18  ;;  %p2183_p1 = scmp.lt.u32.totalorder %s2179_s18, %s2614_s1 }
   0x7   :  { %p2185_p2 = pnand %p2183_p1, %p2180_p0 }
   0x9   :  { %2188 = shalt.err (!%p2185_p2)
}
   0xa   :  { %s2189_s23 = scalar_lea.vmem %s29_s13, 512  ;;  %p2194_p4 = scmp.lt.s32.totalorder %s29_s13, %s29_s13 }
   0xb   :  { %p2190_p3 = scmp.ne.s32.totalorder %s29_s13, %s2189_s23  ;;  %p2195_p5 = scmp.lt.s32.totalorder %s2189_s23, %s2189_s23 }
   0xd   :  { %p2196_p6 = por %p2195_p5, %p2194_p4 }
   0xf   :  { %p2197_p7 = pnand %p2196_p6, %p2190_p3 }
  0x11   :  { %2200 = shalt.err (!%p2197_p7)
}
  0x12   :  { %s2275_s24 = smov 128   ;;  %s2276_s25 = smov 8  }
  0x13   :  { %34 = dma.hbm_to_vmem [thread:$0]  %s2614_s1, 512, %s29_s13, [#allocation6], %s2275_s24, %s2275_s24, %s2276_s25  }
  0x14   :  { %s2201_s30 = scalar_lea.hbm %s2613_s0, 256 }
  0x15   :  { %p2202_p8 = scmp.ne.s32.totalorder %s2613_s0, %s2201_s30  ;;  %p2205_p9 = scmp.lt.u32.totalorder %s2201_s30, %s2613_s0 }
  0x17   :  { %p2207_p10 = pnand %p2205_p9, %p2202_p8 }
  0x19   :  { %2210 = shalt.err (!%p2207_p10)
}
  0x1a   :  { %s2211_s8 = scalar_lea.vmem %s2308_s15, 256  ;;  %p2216_p12 = scmp.lt.s32.totalorder %s2308_s15, %s2308_s15 }
  0x1b   :  { %p2212_p11 = scmp.ne.s32.totalorder %s2308_s15, %s2211_s8  ;;  %p2217_p13 = scmp.lt.s32.totalorder %s2211_s8, %s2211_s8 }
  0x1d   :  { %p2218_p0 = por %p2217_p13, %p2216_p12 }
  0x1f   :  { %p2219_p1 = pnand %p2218_p0, %p2212_p11 }
  0x21   :  { %2222 = shalt.err (!%p2219_p1)
}
  0x22   :  { %22 = dma.hbm_to_vmem [thread:$0]  %s2613_s0, 256, %s2308_s15, [#allocation3], %s2275_s24, %s2275_s24, %s2276_s25  }
  0x23   :  { %s2277_s10 = smov [#allocation7]   ;;  %s2223_s14 = scalar_lea.hbm %s2615_s2, 512 }
  0x24   :  { %s40_s11 = sshll.u32 %s2277_s10, 4  ;;  %p2224_p2 = scmp.ne.s32.totalorder %s2615_s2, %s2223_s14  ;;  %s41_s11 = int_to_ptr.vmem [resolvable:$true] %s40_s11 }
  0x25   :  { %p2227_p3 = scmp.lt.u32.totalorder %s2223_s14, %s2615_s2 }
  0x27   :  { %p2229_p4 = pnand %p2227_p3, %p2224_p2 }
  0x29   :  { %2232 = shalt.err (!%p2229_p4)
}
  0x2a   :  { %s2233_s20 = scalar_lea.vmem %s41_s11, 512  ;;  %p2238_p6 = scmp.lt.s32.totalorder %s41_s11, %s41_s11 }
  0x2b   :  { %p2234_p5 = scmp.ne.s32.totalorder %s41_s11, %s2233_s20  ;;  %p2239_p7 = scmp.lt.s32.totalorder %s2233_s20, %s2233_s20 }
  0x2d   :  { %p2240_p8 = por %p2239_p7, %p2238_p6 }
  0x2f   :  { %p2241_p9 = pnand %p2240_p8, %p2234_p5 }
  0x31   :  { %2244 = shalt.err (!%p2241_p9)
}
  0x32   :  { %46 = dma.hbm_to_vmem [thread:$0]  %s2615_s2, 512, %s41_s11, [#allocation6], %s2275_s24, %s2275_s24, %s2276_s25  }
  0x33   :  { %2267 = dma.done.wait [#allocation3], 256  }
  0x34   :  { %2268 = vsyncadd [#allocation3], 4294967040 }
  0x35   :  { %2269 = dma.done.wait [#allocation6], 1024  }
  0x36   :  { %2270 = vsyncadd [#allocation6], 4294966272  ;;  %vm66_vm0 = vcmask 261120   ;;  %v58_v0 = vld [vmem:[#allocation5] sm:$0xff]  ;;  %v59_v1 = vld [vmem:[#allocation5 + $0x8] sm:$0xff]  ;;  %s2278_s2 = smov 112  }
  0x37   :  { %v60_v2 = vld [vmem:[#allocation5 + $0x10] sm:$0xff]  ;;  %v2052_v3 = vpack.c.bf16 %v59_v1, %v58_v0  ;;  %v61_v4 = vld [vmem:[#allocation5 + $0x18] sm:$0xff]  ;;  %s2279_s21 = smov 120   ;;  %s2280_s22 = smov 104   ;;  %vm176_vm1 = vcmask 64512   ;;  %v2282_v53 = vmov 0.0  }
  0x38   :  { %v56_v5 = vld [vmem:[#allocation2] sm:$0xff]  ;;  %v2056_v6 = vpack.c.bf16 %v61_v4, %v60_v2  ;;  %v57_v7 = vld [vmem:[#allocation2 + $0x8] sm:$0xff]  ;;  %s2281_s23 = smov 96   ;;  %1961 = vmatprep.subr.mxu1 %v2282_v53  ;;  %vm2283_vm4 = vmmov 0   ;;  %s2284_s26 = smov 64  }
  0x39   :  { %1958 = vmatprep.mubr.msk.f32.mxu0 %vm66_vm0, %v56_v5  ;;  %2053 = vmatprep.subr.bf16.mxu0 %v2052_v3  ;;  %s2285_s27 = smov 16   ;;  %s2286_s28 = smov 24  }
  0x3a   :  { %2055 = vmatpush3.bf16.msra.mxu0 %v2052_v3  ;;  %1963 = vmatprep.mubr.msk.f32.mxu1 %vm2283_vm4, %v2282_v53  ;;  %s2287_s29 = smov [#allocation8]  }
  0x3b   :  { %2057 = vmatprep.subr.bf16.mxu0 %v2056_v6  ;;  %s1865_s30 = sshll.u32 %s2287_s29, 4  ;;  %s1866_s30 = int_to_ptr.vmem [resolvable:$true] %s1865_s30 }
  0x3c   :  { %s2245_s4 = scalar_lea.vmem %s1866_s30, 256  ;;  %p2250_p11 = scmp.lt.s32.totalorder %s1866_s30, %s1866_s30 }
  0x3d   :  { %p2246_p10 = scmp.ne.s32.totalorder %s1866_s30, %s2245_s4  ;;  %p2251_p12 = scmp.lt.s32.totalorder %s2245_s4, %s2245_s4 }
  0x3e   :  { %2059 = vmatpush3.bf16.msra.mxu0 %v2056_v6 }
  0x3f   :  { %1981 = vmatprep.subr.mxu0 %v2282_v53  ;;  %p2252_p13 = por %p2251_p12, %p2250_p11 }
  0x41   :  { %1959 = vmatmul.mubr.msk.f32.vlgmr.msra.gmra.mrb[0].mxu0 %vm66_vm0, %v57_v7  ;;  %p2253_p0 = pnand %p2252_p13, %p2246_p10 }
  0x42   :  { %1983 = vmatprep.mubr.msk.f32.mxu0 %vm2283_vm4, %v2282_v53 }
 0x114   :  { %v2362_v8 = vpop.f32.mrb[0].mxu0 }
 0x115   :  { %v2364_v9 = vpop.f32.mrb[1].mxu0  ;;  %v169_v10 = vmul.f32 %v2362_v8, %v2362_v8 }
 0x116   :  { %156 = vrot.lane.b32.xlu1 %v2364_v9, %s2278_s2  ;;  %150 = vrot.lane.b32.xlu0 %v2364_v9, %s2279_s21  ;;  %v168_v11 = vmul.f32 %v2364_v9, %v2364_v9 }
 0x117   :  { %v180_v41 = vsel %vm176_vm1, %v169_v10, 0.0 }
 0x118   :  { %v177_v40 = vsel %vm176_vm1, %v168_v11, 0.0 }
 0x11a   :  { %158 = vrot.lane.b32.xlu1 %v2362_v8, %s2278_s2  ;;  %152 = vrot.lane.b32.xlu0 %v2362_v8, %s2279_s21 }
 0x11e   :  { %164 = vrot.lane.b32.xlu1 %v2362_v8, %s2280_s22  ;;  %162 = vrot.lane.b32.xlu0 %v2364_v9, %s2280_s22 }
 0x122   :  { %267 = vrot.lane.b32.xlu1 %v169_v10, %s2281_s23  ;;  %265 = vrot.lane.b32.xlu0 %v168_v11, %s2281_s23 }
 0x188   :  { %v2378_v12 = vpop.permute.xlu1 %156  ;;  %v2380_v13 = vpop.permute.xlu0 %150 }
 0x189   :  { %v170_v14 = vmul.f32 %v2380_v13, %v2380_v13  ;;  %v172_v18 = vmul.f32 %v2378_v12, %v2378_v12 }
 0x18b   :  { %269 = vrot.lane.b32.xlu0 %v170_v14, %s2281_s23  ;;  %v183_v42 = vsel %vm176_vm1, %v170_v14, 0.0  ;;  %v189_v44 = vsel %vm176_vm1, %v172_v18, 0.0 }
 0x18c   :  { %v2385_v15 = vpop.permute.xlu1 %158  ;;  %v2387_v16 = vpop.permute.xlu0 %152 }
 0x18d   :  { %v171_v17 = vmul.f32 %v2387_v16, %v2387_v16  ;;  %v173_v20 = vmul.f32 %v2385_v15, %v2385_v15 }
 0x18f   :  { %271 = vrot.lane.b32.xlu1 %v171_v17, %s2281_s23  ;;  %273 = vrot.lane.b32.xlu0 %v172_v18, %s2281_s23  ;;  %v186_v43 = vsel %vm176_vm1, %v171_v17, 0.0  ;;  %v192_v45 = vsel %vm176_vm1, %v173_v20, 0.0 }
 0x190   :  { %v2395_v19 = vpop.permute.xlu0 %162  ;;  %v2401_v22 = vpop.permute.xlu1 %164 }
 0x191   :  { %v174_v21 = vmul.f32 %v2395_v19, %v2395_v19  ;;  %v175_v23 = vmul.f32 %v2401_v22, %v2401_v22 }
 0x193   :  { %275 = vrot.lane.b32.xlu1 %v173_v20, %s2281_s23  ;;  %277 = vrot.lane.b32.xlu0 %v174_v21, %s2281_s23  ;;  %v195_v46 = vsel %vm176_vm1, %v174_v21, 0.0  ;;  %v198_v47 = vsel %vm176_vm1, %v175_v23, 0.0 }
 0x194   :  { %v266_v24 = vpop.permute.xlu0 %265  ;;  %v268_v26 = vpop.permute.xlu1 %267 }
 0x195   :  { %v289_v25 = vsel %vm176_vm1, %v266_v24, 0.0  ;;  %v292_v27 = vsel %vm176_vm1, %v268_v26, 0.0 }
 0x197   :  { %279 = vrot.lane.b32.xlu1 %v175_v23, %s2281_s23 }
 0x1b2   :  { %290 = vadd.xlane.f32.xlu0 %v289_v25 }
 0x1bb   :  { %293 = vadd.xlane.f32.xlu1 %v292_v27 }
 0x1fd   :  { %v270_v28 = vpop.permute.xlu0 %269 }
 0x1fe   :  { %v295_v29 = vsel %vm176_vm1, %v270_v28, 0.0 }
 0x1ff   :  { %296 = vadd.xlane.f32.xlu0 %v295_v29 }
 0x201   :  { %v272_v30 = vpop.permute.xlu1 %271  ;;  %v274_v31 = vpop.permute.xlu0 %273 }
 0x202   :  { %v298_v32 = vsel %vm176_vm1, %v272_v30, 0.0  ;;  %v301_v33 = vsel %vm176_vm1, %v274_v31, 0.0 }
 0x203   :  { %299 = vadd.xlane.f32.xlu0 %v298_v32  ;;  %302 = vadd.xlane.f32.xlu1 %v301_v33 }
 0x205   :  { %v276_v34 = vpop.permute.xlu1 %275  ;;  %v278_v35 = vpop.permute.xlu0 %277 }
 0x206   :  { %v304_v36 = vsel %vm176_vm1, %v276_v34, 0.0  ;;  %v307_v37 = vsel %vm176_vm1, %v278_v35, 0.0 }
 0x207   :  { %305 = vadd.xlane.f32.xlu0 %v304_v36  ;;  %308 = vadd.xlane.f32.xlu1 %v307_v37 }
 0x209   :  { %v280_v38 = vpop.permute.xlu1 %279 }
 0x20a   :  { %v310_v39 = vsel %vm176_vm1, %v280_v38, 0.0 }
 0x20b   :  { %311 = vadd.xlane.f32.xlu0 %v310_v39  ;;  %178 = vadd.xlane.f32.xlu1 %v177_v40 }
 0x20f   :  { %181 = vadd.xlane.f32.xlu0 %v180_v41  ;;  %184 = vadd.xlane.f32.xlu1 %v183_v42 }
 0x213   :  { %187 = vadd.xlane.f32.xlu0 %v186_v43  ;;  %190 = vadd.xlane.f32.xlu1 %v189_v44 }
 0x217   :  { %193 = vadd.xlane.f32.xlu0 %v192_v45  ;;  %196 = vadd.xlane.f32.xlu1 %v195_v46 }
 0x21b   :  { %199 = vadd.xlane.f32.xlu0 %v198_v47 }
 0x23f   :  { %v291_v48 = vpop.xlane.xlu0 %290 }
 0x240   :  { %2083 = vrsqrt.f32 %v291_v48  ;;  %vm315_vm2 = vcmp.eq.f32.partialorder %v291_v48, inf  ;;  %v318_v52 = vand.u32 2147483648, %v291_v48  ;;  %vm317_vm3 = vcmp.eq.f32.partialorder %v291_v48, 0.0 }
 0x248   :  { %v294_v49 = vpop.xlane.xlu1 %293 }
 0x249   :  { %2085 = vrsqrt.f32 %v294_v49  ;;  %vm322_vm5 = vcmp.eq.f32.partialorder %v294_v49, inf  ;;  %v325_v59 = vand.u32 2147483648, %v294_v49  ;;  %vm324_vm6 = vcmp.eq.f32.partialorder %v294_v49, 0.0 }
 0x24a   :  { %v2084_v50 = vpop.eup %2083 }
 0x24b   :  { %v314_v51 = vmul.f32 %v2084_v50, %v291_v48 }
 0x24d   :  { %v316_v54 = vsel %vm315_vm2, %v291_v48, %v314_v51 }
 0x24e   :  { %v319_v55 = vsel %vm317_vm3, %v318_v52, %v316_v54 }
 0x24f   :  { %v393_v56 = vmax.f32 %v319_v55, 1e-12 }
 0x251   :  { %2087 = vrcp.f32 %v393_v56 }
 0x253   :  { %v2086_v57 = vpop.eup %2085 }
 0x254   :  { %v321_v58 = vmul.f32 %v2086_v57, %v294_v49 }
 0x256   :  { %v323_v60 = vsel %vm322_vm5, %v294_v49, %v321_v58 }
 0x257   :  { %v326_v61 = vsel %vm324_vm6, %v325_v59, %v323_v60 }
 0x258   :  { %v394_v62 = vmax.f32 %v326_v61, 1e-12 }
 0x25a   :  { %2089 = vrcp.f32 %v394_v62 }
 0x25b   :  { %v2088_v63 = vpop.eup %2087 }
 0x25c   :  { %v402_v0 = vmul.f32 %v2088_v63, %v2364_v9 }
 0x25e   :  { %426 = vrot.lane.b32.xlu1 %v402_v0, %s2281_s23 }
 0x264   :  { %v2090_v1 = vpop.eup %2089 }
 0x265   :  { %v404_v2 = vmul.f32 %v2090_v1, %v2362_v8 }
 0x267   :  { %504 = vrot.lane.b32.xlu0 %v404_v2, %s2281_s23 }
 0x28c   :  { %v297_v3 = vpop.xlane.xlu0 %296 }
 0x28d   :  { %2091 = vrsqrt.f32 %v297_v3  ;;  %vm329_vm7 = vcmp.eq.f32.partialorder %v297_v3, inf  ;;  %v332_v17 = vand.u32 2147483648, %v297_v3  ;;  %vm331_vm8 = vcmp.eq.f32.partialorder %v297_v3, 0.0 }
 0x290   :  { %v303_v4 = vpop.xlane.xlu1 %302  ;;  %v300_v5 = vpop.xlane.xlu0 %299 }
 0x291   :  { %2093 = vrsqrt.f32 %v303_v4  ;;  %vm343_vm9 = vcmp.eq.f32.partialorder %v303_v4, inf  ;;  %v346_v26 = vand.u32 2147483648, %v303_v4  ;;  %vm345_vm10 = vcmp.eq.f32.partialorder %v303_v4, 0.0 }
 0x292   :  { %2095 = vrsqrt.f32 %v300_v5  ;;  %vm336_vm11 = vcmp.eq.f32.partialorder %v300_v5, inf  ;;  %v339_v29 = vand.u32 2147483648, %v300_v5  ;;  %vm338_vm12 = vcmp.eq.f32.partialorder %v300_v5, 0.0 }
 0x294   :  { %v309_v6 = vpop.xlane.xlu1 %308  ;;  %v306_v7 = vpop.xlane.xlu0 %305 }
 0x295   :  { %2097 = vrsqrt.f32 %v309_v6  ;;  %vm357_vm13 = vcmp.eq.f32.partialorder %v309_v6, inf  ;;  %vm359_vm14 = vcmp.eq.f32.partialorder %v309_v6, 0.0  ;;  %v360_v38 = vand.u32 2147483648, %v309_v6 }
 0x296   :  { %2099 = vrsqrt.f32 %v306_v7  ;;  %vm350_vm15 = vcmp.eq.f32.partialorder %v306_v7, inf  ;;  %v353_v41 = vand.u32 2147483648, %v306_v7  ;;  %vm352_vm2 = vcmp.eq.f32.partialorder %v306_v7, 0.0 }
 0x297   :  { %v2092_v10 = vpop.eup %2091 }
 0x298   :  { %v328_v11 = vmul.f32 %v2092_v10, %v297_v3  ;;  %v312_v14 = vpop.xlane.xlu0 %311  ;;  %v179_v42 = vpop.xlane.xlu1 %178 }
 0x299   :  { %2101 = vrsqrt.f32 %v312_v14  ;;  %vm364_vm3 = vcmp.eq.f32.partialorder %v312_v14, inf  ;;  %v367_v50 = vand.u32 2147483648, %v312_v14  ;;  %vm366_vm5 = vcmp.eq.f32.partialorder %v312_v14, 0.0 }
 0x29a   :  { %v330_v18 = vsel %vm329_vm7, %v297_v3, %v328_v11  ;;  %vm203_vm6 = vcmp.eq.f32.partialorder %v179_v42, inf  ;;  %vm205_vm7 = vcmp.eq.f32.partialorder %v179_v42, 0.0 }
 0x29b   :  { %v2094_v20 = vpop.eup %2093  ;;  %v333_v21 = vsel %vm331_vm8, %v332_v17, %v330_v18 }
 0x29c   :  { %v2096_v23 = vpop.eup %2095  ;;  %v395_v24 = vmax.f32 %v333_v21, 1e-12  ;;  %v342_v25 = vmul.f32 %v2094_v20, %v303_v4  ;;  %v182_v57 = vpop.xlane.xlu0 %181 }
 0x29d   :  { %v335_v27 = vmul.f32 %v2096_v23, %v300_v5  ;;  %vm210_vm8 = vcmp.eq.f32.partialorder %v182_v57, inf  ;;  %v185_v20 = vpop.xlane.xlu1 %184  ;;  %v213_v21 = vand.u32 2147483648, %v182_v57 }
 0x29e   :  { %v344_v28 = vsel %vm343_vm9, %v303_v4, %v342_v25  ;;  %2103 = vrcp.f32 %v395_v24  ;;  %vm212_vm9 = vcmp.eq.f32.partialorder %v182_v57, 0.0 }
 0x29f   :  { %v2098_v30 = vpop.eup %2097  ;;  %v347_v31 = vsel %vm345_vm10, %v346_v26, %v344_v28  ;;  %v337_v32 = vsel %vm336_vm11, %v300_v5, %v335_v27  ;;  %vm217_vm10 = vcmp.eq.f32.partialorder %v185_v20, inf }
 0x2a0   :  { %v2100_v33 = vpop.eup %2099  ;;  %v397_v34 = vmax.f32 %v347_v31, 1e-12  ;;  %v340_v35 = vsel %vm338_vm12, %v339_v29, %v337_v32  ;;  %v356_v36 = vmul.f32 %v2098_v30, %v309_v6  ;;  %v188_v26 = vpop.xlane.xlu0 %187  ;;  %vm219_vm12 = vcmp.eq.f32.partialorder %v185_v20, 0.0 }
 0x2a1   :  { %v396_v37 = vmax.f32 %v340_v35, 1e-12  ;;  %v349_v39 = vmul.f32 %v2100_v33, %v306_v7  ;;  %v191_v25 = vpop.xlane.xlu1 %190 }
 0x2a2   :  { %2105 = vrcp.f32 %v397_v34  ;;  %v358_v40 = vsel %vm357_vm13, %v309_v6, %v356_v36  ;;  %vm231_vm11 = vcmp.eq.f32.partialorder %v191_v25, inf  ;;  %vm233_vm13 = vcmp.eq.f32.partialorder %v191_v25, 0.0 }
 0x2a3   :  { %v2102_v43 = vpop.eup %2101  ;;  %2107 = vrcp.f32 %v396_v37  ;;  %v361_v44 = vsel %vm359_vm14, %v360_v38, %v358_v40  ;;  %v351_v45 = vsel %vm350_vm15, %v306_v7, %v349_v39  ;;  %v206_v7 = vand.u32 2147483648, %v179_v42 }
 0x2a4   :  { %v399_v46 = vmax.f32 %v361_v44, 1e-12  ;;  %v354_v47 = vsel %vm352_vm2, %v353_v41, %v351_v45  ;;  %v363_v48 = vmul.f32 %v2102_v43, %v312_v14  ;;  %2109 = vrsqrt.f32 %v179_v42  ;;  %v2461_v30 = vpop.xlane.xlu0 %193 }
 0x2a5   :  { %v398_v49 = vmax.f32 %v354_v47, 1e-12  ;;  %v2458_v28 = vpop.xlane.xlu1 %196  ;;  %v220_v43 = vand.u32 2147483648, %v185_v20  ;;  %v234_v47 = vand.u32 2147483648, %v191_v25  ;;  %vm224_vm14 = vcmp.eq.f32.partialorder %v188_v26, inf }
 0x2a6   :  { %2111 = vrcp.f32 %v399_v46  ;;  %v365_v51 = vsel %vm364_vm3, %v312_v14, %v363_v48  ;;  %vm245_vm15 = vcmp.eq.f32.partialorder %v2458_v28, inf  ;;  %vm226_vm2 = vcmp.eq.f32.partialorder %v188_v26, 0.0 }
 0x2a7   :  { %2113 = vrcp.f32 %v398_v49  ;;  %v368_v52 = vsel %vm366_vm5, %v367_v50, %v365_v51  ;;  %vm238_vm3 = vcmp.eq.f32.partialorder %v2461_v30, inf  ;;  %vm247_vm5 = vcmp.eq.f32.partialorder %v2458_v28, 0.0 }
 0x2a8   :  { %v400_v54 = vmax.f32 %v368_v52, 1e-12  ;;  %v2104_v55 = vpop.eup %2103  ;;  %v2466_v34 = vpop.xlane.xlu0 %199 }
 0x2a9   :  { %v406_v59 = vmul.f32 %v2104_v55, %v2380_v13 }
 0x2aa   :  { %2115 = vrcp.f32 %v400_v54 }
 0x2ab   :  { %2117 = vrsqrt.f32 %v182_v57  ;;  %582 = vrot.lane.b32.xlu1 %v406_v59, %s2281_s23 }
 0x2ac   :  { %v2106_v56 = vpop.eup %2105 }
 0x2ad   :  { %v2108_v58 = vpop.eup %2107  ;;  %v410_v60 = vmul.f32 %v2106_v56, %v2378_v12  ;;  %v227_v56 = vand.u32 2147483648, %v188_v26 }
 0x2ae   :  { %v2110_v61 = vpop.eup %2109  ;;  %v408_v62 = vmul.f32 %v2108_v58, %v2387_v16 }
 0x2af   :  { %738 = vrot.lane.b32.xlu0 %v410_v60, %s2281_s23  ;;  %v202_v2 = vmul.f32 %v2110_v61, %v179_v42  ;;  %v248_v60 = vand.u32 2147483648, %v2458_v28 }
 0x2b0   :  { %v2112_v63 = vpop.eup %2111  ;;  %660 = vrot.lane.b32.xlu1 %v408_v62, %s2281_s23 }
 0x2b1   :  { %v2114_v0 = vpop.eup %2113  ;;  %v414_v1 = vmul.f32 %v2112_v63, %v2395_v19  ;;  %v204_v5 = vsel %vm203_vm6, %v179_v42, %v202_v2  ;;  %v241_v63 = vand.u32 2147483648, %v2461_v30  ;;  %vm240_vm6 = vcmp.eq.f32.partialorder %v2461_v30, 0.0 }
 0x2b2   :  { %v412_v3 = vmul.f32 %v2114_v0, %v2385_v15  ;;  %v207_v11 = vsel %vm205_vm7, %v206_v7, %v204_v5  ;;  %vm252_vm7 = vcmp.eq.f32.partialorder %v2466_v34, inf  ;;  %v255_v5 = vand.u32 2147483648, %v2466_v34 }
 0x2b3   :  { %894 = vrot.lane.b32.xlu0 %v414_v1, %s2281_s23  ;;  %v369_v17 = vmax.f32 %v207_v11, 1e-12 }
 0x2b4   :  { %v2116_v4 = vpop.eup %2115  ;;  %816 = vrot.lane.b32.xlu1 %v412_v3, %s2281_s23 }
 0x2b5   :  { %v416_v6 = vmul.f32 %v2116_v4, %v2401_v22  ;;  %v2118_v10 = vpop.eup %2117  ;;  %2119 = vrcp.f32 %v369_v17 }
 0x2b6   :  { %v209_v14 = vmul.f32 %v2118_v10, %v182_v57 }
 0x2b7   :  { %1197 = vrot.lane.b32.xlu0 %v2362_v8, %s2284_s26 }
 0x2b8   :  { %972 = vrot.lane.b32.xlu1 %v416_v6, %s2281_s23  ;;  %v211_v18 = vsel %vm210_vm8, %v182_v57, %v209_v14  ;;  %vm254_vm8 = vcmp.eq.f32.partialorder %v2466_v34, 0.0 }
 0x2b9   :  { %v214_v23 = vsel %vm212_vm9, %v213_v21, %v211_v18  ;;  %vm1774_vm9 = vcmask 195584  }
 0x2ba   :  { %v370_v24 = vmax.f32 %v214_v23, 1e-12 }
 0x2bb   :  { %1425 = vrot.lane.b32.xlu0 %v2378_v12, %s2284_s26 }
 0x2bc   :  { %1121 = vrot.lane.b32.xlu1 %v2364_v9, %s2284_s26  ;;  %2121 = vrcp.f32 %v370_v24 }
 0x2bd   :  { %2123 = vrsqrt.f32 %v185_v20 }
 0x2be   :  { %2125 = vrsqrt.f32 %v191_v25 }
 0x2bf   :  { %v2120_v27 = vpop.eup %2119  ;;  %2127 = vrsqrt.f32 %v188_v26 }
 0x2c0   :  { %1273 = vrot.lane.b32.xlu1 %v2380_v13, %s2284_s26  ;;  %v378_v29 = vmul.f32 %v2120_v27, %v2364_v9  ;;  %2129 = vrsqrt.f32 %v2458_v28 }
 0x2c1   :  { %2131 = vrsqrt.f32 %v2461_v30 }
 0x2c2   :  { %v417_v32 = vmul.f32 0.35355338, %v378_v29  ;;  %2133 = vrsqrt.f32 %v2466_v34 }
 0x2c4   :  { %1349 = vrot.lane.b32.xlu1 %v2387_v16, %s2284_s26 }
 0x2c6   :  { %v2122_v33 = vpop.eup %2121 }
 0x2c7   :  { %v380_v35 = vmul.f32 %v2122_v33, %v2362_v8  ;;  %v2124_v37 = vpop.eup %2123 }
 0x2c8   :  { %1501 = vrot.lane.b32.xlu1 %v2385_v15, %s2284_s26  ;;  %v2126_v8 = vpop.eup %2125  ;;  %v216_v38 = vmul.f32 %v2124_v37, %v185_v20 }
 0x2c9   :  { %v418_v9 = vmul.f32 0.35355338, %v380_v35  ;;  %v230_v39 = vmul.f32 %v2126_v8, %v191_v25  ;;  %v2128_v40 = vpop.eup %2127 }
 0x2ca   :  { %v2130_v41 = vpop.eup %2129  ;;  %v218_v42 = vsel %vm217_vm10, %v185_v20, %v216_v38  ;;  %v223_v44 = vmul.f32 %v2128_v40, %v188_v26 }
 0x2cb   :  { %v232_v45 = vsel %vm231_vm11, %v191_v25, %v230_v39  ;;  %v2132_v46 = vpop.eup %2131  ;;  %v221_v48 = vsel %vm219_vm12, %v220_v43, %v218_v42  ;;  %v244_v49 = vmul.f32 %v2130_v41, %v2458_v28 }
 0x2cc   :  { %v235_v50 = vsel %vm233_vm13, %v234_v47, %v232_v45  ;;  %v225_v51 = vsel %vm224_vm14, %v188_v26, %v223_v44  ;;  %v237_v52 = vmul.f32 %v2132_v46, %v2461_v30  ;;  %v2134_v54 = vpop.eup %2133  ;;  %v371_v55 = vmax.f32 %v221_v48, 1e-12 }
 0x2cd   :  { %v373_v57 = vmax.f32 %v235_v50, 1e-12  ;;  %v246_v58 = vsel %vm245_vm15, %v2458_v28, %v244_v49  ;;  %v228_v59 = vsel %vm226_vm2, %v227_v56, %v225_v51  ;;  %v251_v62 = vmul.f32 %v2134_v54, %v2466_v34 }
 0x2ce   :  { %v239_v61 = vsel %vm238_vm3, %v2461_v30, %v237_v52  ;;  %2135 = vrcp.f32 %v371_v55  ;;  %v249_v0 = vsel %vm247_vm5, %v248_v60, %v246_v58  ;;  %v372_v1 = vmax.f32 %v228_v59, 1e-12 }
 0x2cf   :  { %2137 = vrcp.f32 %v373_v57  ;;  %v242_v2 = vsel %vm240_vm6, %v241_v63, %v239_v61  ;;  %v375_v3 = vmax.f32 %v249_v0, 1e-12  ;;  %v253_v4 = vsel %vm252_vm7, %v2466_v34, %v251_v62 }
 0x2d0   :  { %v427_v31 = vpop.permute.xlu1 %426  ;;  %2139 = vrcp.f32 %v372_v1  ;;  %v374_v6 = vmax.f32 %v242_v2, 1e-12  ;;  %v256_v7 = vsel %vm254_vm8, %v255_v5, %v253_v4 }
 0x2d1   :  { %1962 = vmatpush3.xpose.msk.msra.mxu1 %vm176_vm1, %v427_v31  ;;  %2141 = vrcp.f32 %v375_v3  ;;  %v376_v10 = vmax.f32 %v256_v7, 1e-12 }
 0x2d2   :  { %1966 = vmatprep.subr.mxu1 %v2282_v53  ;;  %2143 = vrcp.f32 %v374_v6 }
 0x2d3   :  { %2145 = vrcp.f32 %v376_v10 }
 0x2d4   :  { %1964 = vmatmul.mubr.msk.f32.vlgmr.msra.gmra.mrb[0].mxu1 %vm176_vm1, %v417_v32 }
 0x2d5   :  { %1968 = vmatprep.mubr.msk.f32.mxu1 %vm2283_vm4, %v2282_v53 }
 0x2d8   :  { %v2136_v11 = vpop.eup %2135 }
 0x2d9   :  { %v505_v36 = vpop.permute.xlu0 %504  ;;  %v2138_v14 = vpop.eup %2137  ;;  %v382_v17 = vmul.f32 %v2136_v11, %v2380_v13 }
 0x2da   :  { %1967 = vmatpush3.xpose.msk.msra.mxu1 %vm176_vm1, %v505_v36  ;;  %v386_v18 = vmul.f32 %v2138_v14, %v2378_v12  ;;  %v2140_v20 = vpop.eup %2139 }
 0x2db   :  { %1971 = vmatprep.subr.mxu1 %v2282_v53  ;;  %v2142_v24 = vpop.eup %2141  ;;  %v419_v25 = vmul.f32 0.35355338, %v382_v17  ;;  %v384_v26 = vmul.f32 %v2140_v20, %v2387_v16 }
 0x2dc   :  { %v421_v27 = vmul.f32 0.35355338, %v386_v18  ;;  %v2144_v28 = vpop.eup %2143  ;;  %v390_v29 = vmul.f32 %v2142_v24, %v2395_v19 }
 0x2dd   :  { %1969 = vmatmul.mubr.msk.f32.vlgmr.msra.gmra.mrb[2].mxu1 %vm176_vm1, %v418_v9  ;;  %v420_v30 = vmul.f32 0.35355338, %v384_v26  ;;  %v388_v16 = vmul.f32 %v2144_v28, %v2385_v15  ;;  %v2146_v31 = vpop.eup %2145 }
 0x2de   :  { %1973 = vmatprep.mubr.msk.f32.mxu1 %vm2283_vm4, %v2282_v53  ;;  %v423_v33 = vmul.f32 0.35355338, %v390_v29  ;;  %v392_v15 = vmul.f32 %v2146_v31, %v2401_v22 }
 0x2df   :  { %v422_v34 = vmul.f32 0.35355338, %v388_v16 }
 0x2e0   :  { %v424_v36 = vmul.f32 0.35355338, %v392_v15 }
 0x31d   :  { %v583_v21 = vpop.permute.xlu1 %582 }
 0x31e   :  { %1972 = vmatpush3.xpose.msk.msra.mxu1 %vm176_vm1, %v583_v21 }
 0x31f   :  { %1976 = vmatprep.subr.mxu1 %v2282_v53 }
 0x321   :  { %v739_v23 = vpop.permute.xlu0 %738  ;;  %1974 = vmatmul.mubr.msk.f32.vlgmr.msra.gmra.mrb[4].mxu1 %vm176_vm1, %v419_v25 }
 0x322   :  { %1982 = vmatpush3.xpose.msk.msra.mxu0 %vm176_vm1, %v739_v23  ;;  %v661_v12 = vpop.permute.xlu1 %660  ;;  %1978 = vmatprep.mubr.msk.f32.mxu1 %vm2283_vm4, %v2282_v53 }
 0x323   :  { %1991 = vmatprep.subr.mxu0 %v2282_v53  ;;  %1977 = vmatpush3.xpose.msk.msra.mxu1 %vm176_vm1, %v661_v12 }
 0x324   :  { %1986 = vmatprep.subr.mxu1 %v2282_v53 }
 0x325   :  { %v895_v13 = vpop.permute.xlu0 %894  ;;  %1984 = vmatmul.mubr.msk.f32.vlgmr.msra.gmra.mrb[2].mxu0 %vm176_vm1, %v421_v27 }
 0x326   :  { %1992 = vmatpush3.xpose.msk.msra.mxu0 %vm176_vm1, %v895_v13  ;;  %1993 = vmatprep.mubr.msk.f32.mxu0 %vm2283_vm4, %v2282_v53  ;;  %v817_v32 = vpop.permute.xlu1 %816 }
 0x327   :  { %2001 = vmatprep.subr.mxu0 %v2282_v53  ;;  %1979 = vmatmul.mubr.msk.f32.vlgmr.msra.gmra.mrb[6].mxu1 %vm176_vm1, %v420_v30 }
 0x328   :  { %1987 = vmatpush3.xpose.msk.msra.mxu1 %vm176_vm1, %v817_v32  ;;  %1988 = vmatprep.mubr.msk.f32.mxu1 %vm2283_vm4, %v2282_v53 }
 0x329   :  { %1994 = vmatmul.mubr.msk.f32.vlgmr.msra.gmra.mrb[4].mxu0 %vm176_vm1, %v423_v33  ;;  %1996 = vmatprep.subr.mxu1 %v2282_v53  ;;  %v1198_v9 = vpop.permute.xlu0 %1197 }
 0x32a   :  { %2003 = vmatprep.mubr.msk.f32.mxu0 %vm2283_vm4, %v2282_v53  ;;  %v973_v35 = vpop.permute.xlu1 %972 }
 0x32b   :  { %1989 = vmatmul.mubr.msk.f32.vlgmr.msra.gmra.mrb[8].mxu1 %vm176_vm1, %v422_v34 }
 0x32c   :  { %1997 = vmatpush3.xpose.msk.msra.mxu1 %vm176_vm1, %v973_v35  ;;  %1998 = vmatprep.mubr.msk.f32.mxu1 %vm2283_vm4, %v2282_v53 }
 0x32d   :  { %2006 = vmatprep.subr.mxu1 %v2282_v53  ;;  %v1426_v63 = vpop.permute.xlu0 %1425 }
 0x32e   :  { %v1122_v37 = vpop.permute.xlu1 %1121 }
 0x32f   :  { %1999 = vmatmul.mubr.msk.f32.vlgmr.msra.gmra.mrb[10].mxu1 %vm176_vm1, %v424_v36  ;;  %2002 = vmatpush3.msra.mxu0 %v1122_v37 }
 0x330   :  { %2007 = vmatpush3.msra.mxu1 %v1198_v9  ;;  %2011 = vmatprep.subr.mxu0 %v2282_v53 }
 0x331   :  { %2008 = vmatprep.mubr.msk.f32.mxu1 %vm2283_vm4, %v2282_v53  ;;  %2016 = vmatprep.subr.mxu1 %v2282_v53 }
 0x332   :  { %v1274_v62 = vpop.permute.xlu1 %1273 }
 0x336   :  { %v1350_v0 = vpop.permute.xlu1 %1349 }
 0x33a   :  { %v1502_v4 = vpop.permute.xlu1 %1501 }
 0x3a7   :  { %v499_v8 = vpop.f32.mrb[0].mxu1 }
 0x3a8   :  { %v1965_v38 = vpop.f32.mrb[1].mxu1  ;;  %v1049_v39 = vsel %vm176_vm1, %v499_v8, -inf }
 0x3a9   :  { %1050 = vmax.xlane.f32.xlu0 %v1049_v39 }
 0x3b0   :  { %v577_v40 = vpop.f32.mrb[2].mxu1 }
 0x3b1   :  { %v1970_v41 = vpop.f32.mrb[3].mxu1  ;;  %v1052_v42 = vsel %vm176_vm1, %v577_v40, -inf }
 0x3b2   :  { %1053 = vmax.xlane.f32.xlu1 %v1052_v42 }
 0x3f4   :  { %v655_v43 = vpop.f32.mrb[4].mxu1 }
 0x3f5   :  { %v1975_v45 = vpop.f32.mrb[5].mxu1  ;;  %v1055_v46 = vsel %vm176_vm1, %v655_v43, -inf }
 0x3f6   :  { %1056 = vmax.xlane.f32.xlu0 %v1055_v46 }
 0x3f8   :  { %v811_v44 = vpop.f32.mrb[2].mxu0 }
 0x3f9   :  { %v1985_v47 = vpop.f32.mrb[3].mxu0  ;;  %v1061_v48 = vsel %vm176_vm1, %v811_v44, -inf }
 0x3fa   :  { %1062 = vmax.xlane.f32.xlu1 %v1061_v48  ;;  %v733_v49 = vpop.f32.mrb[6].mxu1 }
 0x3fb   :  { %v1980_v50 = vpop.f32.mrb[7].mxu1  ;;  %v1058_v51 = vsel %vm176_vm1, %v733_v49, -inf }
 0x3fc   :  { %1059 = vmax.xlane.f32.xlu0 %v1058_v51  ;;  %v967_v52 = vpop.f32.mrb[4].mxu0  ;;  %v62_v51 = vld [vmem:[#allocation7] sm:$0xff] }
 0x3fd   :  { %v1995_v54 = vpop.f32.mrb[5].mxu0  ;;  %v1067_v55 = vsel %vm176_vm1, %v967_v52, -inf }
 0x3fe   :  { %v889_v56 = vpop.f32.mrb[8].mxu1  ;;  %1068 = vmax.xlane.f32.xlu1 %v1067_v55 }
 0x3ff   :  { %v1990_v57 = vpop.f32.mrb[9].mxu1  ;;  %v1064_v58 = vsel %vm176_vm1, %v889_v56, -inf }
 0x400   :  { %1065 = vmax.xlane.f32.xlu0 %v1064_v58  ;;  %v65_v57 = vld [vmem:[#allocation7 + $0x18] sm:$0xff] }
 0x402   :  { %v1045_v59 = vpop.f32.mrb[10].mxu1 }
 0x403   :  { %v2000_v60 = vpop.f32.mrb[11].mxu1  ;;  %v1070_v61 = vsel %vm176_vm1, %v1045_v59, -inf }
 0x404   :  { %1071 = vmax.xlane.f32.xlu0 %v1070_v61 }
 0x40f   :  { %1653 = vrot.lane.b32.xlu1 %v2401_v22, %s2284_s26 }
 0x41a   :  { %1577 = vrot.lane.b32.xlu0 %v2395_v19, %s2284_s26 }
 0x436   :  { %v1051_v1 = vpop.xlane.xlu0 %1050 }
 0x437   :  { %v1073_v2 = vsub.f32 %v499_v8, %v1051_v1 }
 0x439   :  { %v1081_v3 = vmul.f32 1.442695, %v1073_v2 }
 0x43b   :  { %2147 = vpow2.f32 %v1081_v3 }
 0x43f   :  { %v1054_v5 = vpop.xlane.xlu1 %1053 }
 0x440   :  { %v1074_v6 = vsub.f32 %v577_v40, %v1054_v5 }
 0x442   :  { %v1083_v7 = vmul.f32 1.442695, %v1074_v6 }
 0x444   :  { %2149 = vpow2.f32 %v1083_v7 }
 0x445   :  { %v2544_v10 = vpop.eup %2147 }
 0x446   :  { %2004 = vmatmul.mubr.msk.f32.vlgmr.msra.gmra.mrb[6].mxu0 %vm176_vm1, %v2544_v10  ;;  %v1097_v42 = vsel %vm176_vm1, %v2544_v10, 0.0 }
 0x447   :  { %2012 = vmatpush3.msra.mxu0 %v1274_v62  ;;  %2013 = vmatprep.mubr.msk.f32.mxu0 %vm2283_vm4, %v2282_v53 }
 0x448   :  { %2021 = vmatprep.subr.mxu0 %v2282_v53 }
 0x44e   :  { %v2551_v19 = vpop.eup %2149 }
 0x44f   :  { %2009 = vmatmul.mubr.msk.f32.vlgmr.msra.gmra.mrb[12].mxu1 %vm176_vm1, %v2551_v19 }
 0x450   :  { %2017 = vmatpush3.msra.mxu1 %v1350_v0  ;;  %2018 = vmatprep.mubr.msk.f32.mxu1 %vm2283_vm4, %v2282_v53 }
 0x451   :  { %2026 = vmatprep.subr.mxu1 %v2282_v53 }
 0x483   :  { %v1057_v22 = vpop.xlane.xlu0 %1056 }
 0x484   :  { %v1075_v14 = vsub.f32 %v655_v43, %v1057_v22  ;;  %v1100_v43 = vsel %vm176_vm1, %v2551_v19, 0.0 }
 0x486   :  { %v1085_v18 = vmul.f32 1.442695, %v1075_v14 }
 0x487   :  { %v1063_v11 = vpop.xlane.xlu1 %1062 }
 0x488   :  { %v1077_v17 = vsub.f32 %v811_v44, %v1063_v11  ;;  %2151 = vpow2.f32 %v1085_v18 }
 0x489   :  { %v1060_v21 = vpop.xlane.xlu0 %1059 }
 0x48a   :  { %v1089_v20 = vmul.f32 1.442695, %v1077_v17  ;;  %v1076_v23 = vsub.f32 %v733_v49, %v1060_v21 }
 0x48b   :  { %v1069_v24 = vpop.xlane.xlu1 %1068 }
 0x48c   :  { %2153 = vpow2.f32 %v1089_v20  ;;  %v1087_v25 = vmul.f32 1.442695, %v1076_v23  ;;  %v1079_v26 = vsub.f32 %v967_v52, %v1069_v24  ;;  %v63_v52 = vld [vmem:[#allocation7 + $0x8] sm:$0xff] }
 0x48d   :  { %v1066_v27 = vpop.xlane.xlu0 %1065  ;;  %v2060_v54 = vpack.c.bf16 %v63_v52, %v62_v51 }
 0x48e   :  { %2155 = vpow2.f32 %v1087_v25  ;;  %v1078_v28 = vsub.f32 %v889_v56, %v1066_v27  ;;  %v1093_v12 = vmul.f32 1.442695, %v1079_v26  ;;  %v64_v56 = vld [vmem:[#allocation7 + $0x10] sm:$0xff] }
 0x48f   :  { %v1654_v38 = vpop.permute.xlu1 %1653 }
 0x490   :  { %v1091_v13 = vmul.f32 1.442695, %v1078_v28  ;;  %2157 = vpow2.f32 %v1093_v12 }
 0x491   :  { %v1072_v29 = vpop.xlane.xlu0 %1071 }
 0x492   :  { %2159 = vpow2.f32 %v1091_v13  ;;  %v1080_v30 = vsub.f32 %v1045_v59, %v1072_v29  ;;  %v2152_v16 = vpop.eup %2151  ;;  %v2064_v59 = vpack.c.bf16 %v65_v57, %v64_v56 }
 0x493   :  { %2014 = vmatmul.mubr.msk.f32.vlgmr.msra.gmra.mrb[8].mxu0 %vm176_vm1, %v2152_v16  ;;  %v1103_v33 = vsel %vm176_vm1, %v2152_v16, 0.0 }
 0x494   :  { %v1095_v31 = vmul.f32 1.442695, %v1080_v30  ;;  %2022 = vmatpush3.msra.mxu0 %v1426_v63  ;;  %1104 = vadd.xlane.f32.xlu0 %v1103_v33 }
 0x495   :  { %2023 = vmatprep.mubr.msk.f32.mxu0 %vm2283_vm4, %v2282_v53  ;;  %2031 = vmatprep.subr.mxu0 %v2282_v53  ;;  %v1578_v35 = vpop.permute.xlu0 %1577 }
 0x496   :  { %v2154_v32 = vpop.eup %2153  ;;  %2161 = vpow2.f32 %v1095_v31 }
 0x497   :  { %v1109_v15 = vsel %vm176_vm1, %v2154_v32, 0.0  ;;  %2024 = vmatmul.mubr.msk.f32.vlgmr.msra.gmra.mrb[10].mxu0 %vm176_vm1, %v2154_v32 }
 0x498   :  { %v2156_v34 = vpop.eup %2155  ;;  %2032 = vmatpush3.msra.mxu0 %v1578_v35  ;;  %1110 = vadd.xlane.f32.xlu0 %v1109_v15 }
 0x499   :  { %2019 = vmatmul.mubr.msk.f32.vlgmr.msra.gmra.mrb[14].mxu1 %vm176_vm1, %v2156_v34  ;;  %v1106_v36 = vsel %vm176_vm1, %v2156_v34, 0.0  ;;  %2033 = vmatprep.mubr.msk.f32.mxu0 %vm2283_vm4, %v2282_v53 }
 0x49a   :  { %v2158_v9 = vpop.eup %2157  ;;  %2027 = vmatpush3.msra.mxu1 %v1502_v4  ;;  %1107 = vadd.xlane.f32.xlu1 %v1106_v36 }
 0x49b   :  { %2028 = vmatprep.mubr.msk.f32.mxu1 %vm2283_vm4, %v2282_v53  ;;  %v1115_v8 = vsel %vm176_vm1, %v2158_v9, 0.0  ;;  %2036 = vmatprep.subr.mxu1 %v2282_v53 }
 0x49c   :  { %v2160_v37 = vpop.eup %2159  ;;  %2034 = vmatmul.mubr.msk.f32.vlgmr.msra.gmra.mrb[12].mxu0 %vm176_vm1, %v2158_v9  ;;  %2061 = vmatprep.subr.bf16.mxu0 %v2060_v54 }
 0x49d   :  { %2029 = vmatmul.mubr.msk.f32.vlgmr.msra.gmra.mrb[16].mxu1 %vm176_vm1, %v2160_v37  ;;  %v1112_v39 = vsel %vm176_vm1, %v2160_v37, 0.0  ;;  %2063 = vmatpush3.bf16.msra.mxu0 %v2060_v54 }
 0x49e   :  { %2037 = vmatpush3.msra.mxu1 %v1654_v38  ;;  %1113 = vadd.xlane.f32.xlu0 %v1112_v39 }
 0x49f   :  { %1116 = vadd.xlane.f32.xlu1 %v1115_v8  ;;  %2038 = vmatprep.mubr.msk.f32.mxu1 %vm2283_vm4, %v2282_v53  ;;  %vm1771_vm4 = vcmask 130048  }
 0x4a0   :  { %v2162_v40 = vpop.eup %2161  ;;  %2065 = vmatprep.subr.bf16.mxu0 %v2064_v59 }
 0x4a1   :  { %2039 = vmatmul.mubr.msk.f32.vlgmr.msra.gmra.mrb[18].mxu1 %vm176_vm1, %v2162_v40  ;;  %v1118_v41 = vsel %vm176_vm1, %v2162_v40, 0.0  ;;  %2067 = vmatpush3.bf16.msra.mxu0 %v2064_v59 }
 0x4a2   :  { %1119 = vadd.xlane.f32.xlu0 %v1118_v41 }
 0x4a3   :  { %1098 = vadd.xlane.f32.xlu1 %v1097_v42 }
 0x4a6   :  { %1101 = vadd.xlane.f32.xlu0 %v1100_v43 }
 0x519   :  { %v2584_v44 = vpop.f32.mrb[6].mxu0 }
 0x51a   :  { %v2005_v45 = vpop.f32.mrb[7].mxu0 }
 0x521   :  { %v1105_v53 = vpop.xlane.xlu0 %1104 }
 0x522   :  { %v2586_v46 = vpop.f32.mrb[12].mxu1  ;;  %2163 = vrcp.f32 %v1105_v53 }
 0x523   :  { %v2010_v47 = vpop.f32.mrb[13].mxu1 }
 0x525   :  { %v1111_v48 = vpop.xlane.xlu0 %1110 }
 0x526   :  { %2165 = vrcp.f32 %v1111_v48 }
 0x527   :  { %v1108_v49 = vpop.xlane.xlu1 %1107 }
 0x528   :  { %2167 = vrcp.f32 %v1108_v49 }
 0x52b   :  { %v1114_v50 = vpop.xlane.xlu0 %1113 }
 0x52c   :  { %v1117_v55 = vpop.xlane.xlu1 %1116  ;;  %2169 = vrcp.f32 %v1114_v50  ;;  %v2164_v60 = vpop.eup %2163 }
 0x52d   :  { %2171 = vrcp.f32 %v1117_v55 }
 0x52f   :  { %v1120_v58 = vpop.xlane.xlu0 %1119 }
 0x530   :  { %2173 = vrcp.f32 %v1120_v58  ;;  %v2166_v0 = vpop.eup %2165  ;;  %v1099_v26 = vpop.xlane.xlu1 %1098 }
 0x531   :  { %2175 = vrcp.f32 %v1099_v26 }
 0x532   :  { %v2168_v1 = vpop.eup %2167 }
 0x533   :  { %v1102_v27 = vpop.xlane.xlu0 %1101 }
 0x534   :  { %2177 = vrcp.f32 %v1102_v27 }
 0x536   :  { %v2170_v10 = vpop.eup %2169 }
 0x537   :  { %v2172_v22 = vpop.eup %2171 }
 0x53a   :  { %v2174_v21 = vpop.eup %2173 }
 0x53b   :  { %v2176_v12 = vpop.eup %2175 }
 0x53c   :  { %v1737_v16 = vmul.f32 %v2176_v12, %v2584_v44 }
 0x53e   :  { %v2178_v30 = vpop.eup %2177 }
 0x53f   :  { %v1738_v33 = vmul.f32 %v2178_v30, %v2586_v46 }
 0x566   :  { %v1345_v61 = vpop.f32.mrb[8].mxu0 }
 0x567   :  { %v1739_v62 = vmul.f32 %v2164_v60, %v1345_v61  ;;  %v2015_v63 = vpop.f32.mrb[9].mxu0 }
 0x569   :  { %1747 = vrot.lane.b32.xlu1 %v1739_v62, %s2276_s25 }
 0x56a   :  { %v1497_v3 = vpop.f32.mrb[10].mxu0 }
 0x56b   :  { %v1741_v5 = vmul.f32 %v2166_v0, %v1497_v3  ;;  %v2025_v7 = vpop.f32.mrb[11].mxu0 }
 0x56c   :  { %v1421_v2 = vpop.f32.mrb[14].mxu1 }
 0x56d   :  { %v1740_v4 = vmul.f32 %v2168_v1, %v1421_v2  ;;  %v2020_v6 = vpop.f32.mrb[15].mxu1  ;;  %1755 = vrot.lane.b32.xlu1 %v1741_v5, %s2285_s27 }
 0x56f   :  { %1749 = vrot.lane.b32.xlu0 %v1740_v4, %s2276_s25  ;;  %v1649_v14 = vpop.f32.mrb[12].mxu0 }
 0x570   :  { %v1573_v19 = vpop.f32.mrb[16].mxu1  ;;  %v1743_v18 = vmul.f32 %v2172_v22, %v1649_v14  ;;  %v2035_v20 = vpop.f32.mrb[13].mxu0 }
 0x571   :  { %v1742_v11 = vmul.f32 %v2170_v10, %v1573_v19  ;;  %v2030_v17 = vpop.f32.mrb[17].mxu1 }
 0x573   :  { %1757 = vrot.lane.b32.xlu1 %v1742_v11, %s2285_s27  ;;  %1763 = vrot.lane.b32.xlu0 %v1743_v18, %s2286_s28 }
 0x574   :  { %v1725_v23 = vpop.f32.mrb[18].mxu1 }
 0x575   :  { %v1744_v24 = vmul.f32 %v2174_v21, %v1725_v23  ;;  %v2040_v25 = vpop.f32.mrb[19].mxu1 }
 0x577   :  { %1765 = vrot.lane.b32.xlu1 %v1744_v24, %s2286_s28 }
 0x5db   :  { %v1748_v28 = vpop.permute.xlu1 %1747 }
 0x5dc   :  { %v1769_v31 = vsel %vm176_vm1, %v1737_v16, %v1748_v28 }
 0x5df   :  { %v1756_v29 = vpop.permute.xlu1 %1755 }
 0x5e0   :  { %v1772_v34 = vsel %vm1771_vm4, %v1769_v31, %v1756_v29 }
 0x5e1   :  { %v1750_v13 = vpop.permute.xlu0 %1749 }
 0x5e2   :  { %v1770_v36 = vsel %vm176_vm1, %v1738_v33, %v1750_v13 }
 0x5e5   :  { %v1758_v32 = vpop.permute.xlu1 %1757  ;;  %v1764_v15 = vpop.permute.xlu0 %1763 }
 0x5e6   :  { %v1775_v35 = vsel %vm1774_vm9, %v1772_v34, %v1764_v15  ;;  %v1773_v9 = vsel %vm1771_vm4, %v1770_v36, %v1758_v32 }
 0x5e7   :  { %2049 = vmatprep.mubr.msk.f32.mxu0 %vm66_vm0, %v1775_v35 }
 0x5e9   :  { %v1766_v37 = vpop.permute.xlu1 %1765 }
 0x5ea   :  { %v1776_v8 = vsel %vm1774_vm9, %v1773_v9, %v1766_v37 }
 0x5eb   :  { %2050 = vmatmul.mubr.msk.f32.vlgmr.msra.gmra.mrb[14].mxu0 %vm66_vm0, %v1776_v8 }
 0x6be   :  { %v2051_v38 = vpop.f32.mrb[14].mxu0 }
 0x6bf   :  { %1859 = vst.msk [vmem:[#allocation8 + $0x8] sm:$0xff] %vm66_vm0, %v2051_v38  ;;  %v1849_v39 = vpop.f32.mrb[15].mxu0 }
 0x6c0   :  { %1858 = vst.msk [vmem:[#allocation8] sm:$0xff] %vm66_vm0, %v1849_v39 }
 0x6c1   :  { %2256 = shalt.err (!%p2253_p0)
}
 0x6c2   :  { %s2257_s7 = scalar_lea.hbm %s2616_s3, 256 }
 0x6c3   :  { %p2258_p1 = scmp.ne.s32.totalorder %s2616_s3, %s2257_s7  ;;  %p2261_p2 = scmp.lt.u32.totalorder %s2257_s7, %s2616_s3 }
 0x6c5   :  { %p2263_p3 = pnand %p2261_p2, %p2258_p1 }
 0x6c7   :  { %2266 = shalt.err (!%p2263_p3)
}
 0x6c8   :  { %1871 = dma.vmem_to_hbm [thread:$0]  %s1866_s30, 256, %s2616_s3, [#allocation4], %s2275_s24, %s2275_s24, %s2276_s25  }
 0x6c9   :  { %2271 = dma.done.wait [#allocation4], 256  }
 0x6ca   :  { %2272 = vsyncadd [#allocation4], 4294967040 }
 0x6cb   :  { %1875 = vsyncpa [#allocation3], 1 }
 0x6cc   :  { %1876 = vsyncpa [#allocation6], 1 }
 0x6cd   :  { %1877 = vsyncpa [#allocation4], 1 }

</bundles_post_ra>
